<compile_context>
chip_gen: v6e
topology: v6e:2x2x1
jax: 0.10.0
libtpu: 0.0.40
codegen_flags: <defaults>
</compile_context>

<pallas_src>
import functools

import jax
import jax.numpy as jnp
from jax import lax
from jax.experimental import pallas as pl
from jax.experimental.pallas import tpu as pltpu


def _focal_loss_kernel(*refs, gamma, c, hw, thw, bn, alpha_mode, needs_mask):
    if alpha_mode == "none":
        x_ref, t_ref, out_ref = refs
        a_ref = None
    else:
        x_ref, t_ref, a_ref, out_ref = refs

    x = x_ref[...].astype(jnp.float32)          # (bn, C, THW) logits tile
    t = t_ref[...]                              # (bn, 1, THW) int32 targets

    # log-softmax over the class (sublane) axis, without materializing logp.
    m = jnp.max(x, axis=1, keepdims=True)       # (bn, 1, THW)
    z = x - m
    lse = jnp.log(jnp.sum(jnp.exp(z), axis=1, keepdims=True))   # (bn, 1, THW)

    # gather(1, target) via a one-hot compare against a tiny (1, C, 1) iota.
    cls = lax.broadcasted_iota(jnp.int32, (1, c, 1), 1)
    onehot = cls == t                                           # (bn, C, THW)
    zt = jnp.sum(jnp.where(onehot, z, 0.0), axis=1, keepdims=True)
    logpt = zt - lse                                            # (bn, 1, THW)
    pt = jnp.exp(logpt)                                         # pt before alpha

    # Per-pixel alpha weight.
    if alpha_mode == "none":
        logpt_w = logpt
    elif alpha_mode == "smem":
        # Small C: scalar select chain over SMEM alphas (no one-hot / XLU reduce).
        at = jnp.zeros(t.shape, jnp.float32)
        for k in range(c):
            at = jnp.where(t == k, a_ref[k], at)
        logpt_w = logpt * at
    else:  # "vmem": generic C, one-hot gather of the resident (1, C, 1) alpha.
        at = jnp.sum(jnp.where(onehot, a_ref[...], 0.0), axis=1, keepdims=True)
        logpt_w = logpt * at

    # Focal term: integer gamma -> repeated VPU multiplies (no pow / EUP work).
    g = float(gamma)
    if g.is_integer() and g >= 0:
        gi = int(g)
        if gi == 0:
            loss = -logpt_w
        else:
            u = 1.0 - pt
            focal = u
            for _ in range(gi - 1):
                focal = focal * u
            loss = -focal * logpt_w
    else:
        loss = -((1.0 - pt) ** g) * logpt_w                    # (bn, 1, THW)

    # Ragged spatial tail: select (not multiply) so OOB garbage cannot leak.
    if needs_mask:
        rem = hw - pl.program_id(1) * thw
        lane = lax.broadcasted_iota(jnp.int32, (1, 1, thw), 2)
        loss = jnp.where(lane < rem, loss, 0.0)

    # Lane-dense partial: fold batch rows + 128-lane chunks with pure VPU adds,
    # then one unmasked (1, 128) store. Final reduction happens outside.
    lane_rows = jnp.sum(loss, axis=0)                           # (1, THW)
    acc = lane_rows[:, 0:128]
    for r in range(1, thw // 128):
        acc = acc + lane_rows[:, r * 128:(r + 1) * 128]
    out_ref[0, 0] = acc                                         # (1, 128)


def _round_up(v, m):
    return ((v + m - 1) // m) * m


def _largest_divisor_leq(n, cap):
    cap = max(1, min(n, cap))
    for d in range(cap, 0, -1):
        if n % d == 0:
            return d
    return 1


def focal_loss_2d(logits_nchw, target_nhw, *, gamma=2.0, alpha=None,
                  size_average=True, max_thw=8192):
    """Pallas implementation of FocalLoss2d.forward for 4-D NCHW inputs."""
    n, c, h, w = logits_nchw.shape
    hw = h * w
    m_total = n * hw

    # NCHW-native: free reshapes of contiguous tensors; NO padding copies.
    x = logits_nchw.reshape(n, c, hw)
    t = target_nhw.reshape(n, 1, hw).astype(jnp.int32)

    # Per-class alpha, following the module's constructor semantics.
    alpha_mode = "none"
    alpha_arr = None
    if alpha is not None:
        if isinstance(alpha, (float, int)) and not isinstance(alpha, bool):
            assert c == 2, "scalar alpha builds a 2-entry table; requires C == 2"
            avec = jnp.array([float(alpha), 1.0 - float(alpha)], jnp.float32)
        else:
            avec = jnp.asarray(alpha, jnp.float32).reshape(-1)
            assert avec.shape[0] == c, "per-class alpha must have length C"
        if c <= 8:
            alpha_mode = "smem"
            alpha_arr = avec                       # (C,) scalars in SMEM
        else:
            alpha_mode = "vmem"
            alpha_arr = avec.reshape(1, c, 1)      # resident VMEM block

    # VMEM-aware lane tile: ~1 MiB per (C_pad, THW) f32 tile, clamp [512, 8192].
    hw_round = _round_up(hw, 128)
    c_pad = _round_up(c, 8)
    budget = (1 << 20) // (4 * c_pad)
    budget = max(512, budget)
    budget = min(budget, int(max_thw))
    budget = max(128, (budget // 128) * 128)

    if hw_round >= budget:
        thw = budget
        bn = 1
    else:
        # Small images: pack several batch elements per grid step (bn | N).
        thw = hw_round
        bn = _largest_divisor_leq(n, max(1, budget // hw_round))

    grid = (n // bn, pl.cdiv(hw, thw))
    needs_mask = (hw % thw) != 0

    kernel = functools.partial(
        _focal_loss_kernel, gamma=float(gamma), c=c, hw=hw, thw=thw, bn=bn,
        alpha_mode=alpha_mode, needs_mask=needs_mask)

    in_specs = [
        pl.BlockSpec((bn, c, thw), lambda i, j: (i, 0, j)),   # logits
        pl.BlockSpec((bn, 1, thw), lambda i, j: (i, 0, j)),   # targets
    ]
    args = [x, t]
    if alpha_mode == "smem":
        in_specs.append(pl.BlockSpec(memory_space=pltpu.MemorySpace.SMEM))
        args.append(alpha_arr)
    elif alpha_mode == "vmem":
        in_specs.append(pl.BlockSpec((1, c, 1), lambda i, j: (0, 0, 0)))
        args.append(alpha_arr)

    # VMEM budget estimate: 2x double-buffered input blocks + ~8 full-tile f32
    # temps + slack; floor at the 32 MiB scoped default, cap v7x-safe (48 MiB).
    itemsize = jnp.dtype(logits_nchw.dtype).itemsize
    block_in = bn * c_pad * thw * itemsize + bn * 8 * thw * 4
    need = 2 * block_in + 8 * bn * c_pad * thw * 4 + (2 << 20)
    vmem_limit = int(min(48 << 20, max(32 << 20, need)))

    partials = pl.pallas_call(
        kernel,
        out_shape=jax.ShapeDtypeStruct((grid[0], grid[1], 1, 128), jnp.float32),
        grid_spec=pltpu.PrefetchScalarGridSpec(
            num_scalar_prefetch=0,
            grid=grid,
            in_specs=in_specs,
            out_specs=pl.BlockSpec((1, 1, 1, 128), lambda i, j: (i, j, 0, 0)),
        ),
        compiler_params=pltpu.CompilerParams(
            dimension_semantics=("parallel", "parallel"),
            vmem_limit_bytes=vmem_limit),
    )(*args)

    total = jnp.sum(partials)
    if size_average:
        total = total / jnp.float32(m_total)
    return total


def _reference(logits_nchw, target_nhw, gamma, alpha_vec, size_average):
    n, c, h, w = logits_nchw.shape
    xf = jnp.transpose(logits_nchw, (0, 2, 3, 1)).reshape(-1, c).astype(jnp.float32)
    tf = target_nhw.reshape(-1).astype(jnp.int32)
    logp = jax.nn.log_softmax(xf, axis=1)
    logpt = jnp.take_along_axis(logp, tf[:, None], axis=1)[:, 0]
    pt = jnp.exp(logpt)
    if alpha_vec is not None:
        at = jnp.asarray(alpha_vec, jnp.float32)[tf]
        logpt = logpt * at
    loss = -1.0 * (1.0 - pt) ** gamma * logpt
    return jnp.mean(loss) if size_average else jnp.sum(loss)


if __name__ == "__main__":
    key = jax.random.PRNGKey(0)
    ks = jax.random.split(key, 8)

    # Case 1: module-style small shape, per-class alpha (SMEM select path),
    # batch-blocked small images, mean reduction, no tail mask.
    N, C, H, W = 2, 4, 16, 16
    alpha1 = [0.1, 0.2, 0.3, 0.4]
    x1 = jax.random.normal(ks[0], (N, C, H, W), dtype=jnp.float32)
    t1 = jax.random.randint(ks[1], (N, H, W), 0, C, dtype=jnp.int32)
    got1 = jax.block_until_ready(
        focal_loss_2d(x1, t1, gamma=2.0, alpha=alpha1, size_average=True))
    ref1 = _reference(x1, t1, 2.0, alpha1, True)
    assert jnp.allclose(got1, ref1, rtol=1e-5, atol=1e-5), (got1, ref1)

    # Case 2: ragged spatial extent (in-kernel lane mask), alpha=None, sum.
    x2 = jax.random.normal(ks[2], (2, 3, 9, 13), dtype=jnp.float32)
    t2 = jax.random.randint(ks[3], (2, 9, 13), 0, 3, dtype=jnp.int32)
    got2 = jax.block_until_ready(
        focal_loss_2d(x2, t2, gamma=2.0, alpha=None, size_average=False))
    ref2 = _reference(x2, t2, 2.0, None, False)
    assert jnp.allclose(got2, ref2, rtol=1e-5, atol=1e-4), (got2, ref2)

    # Case 3: scalar alpha (C==2), multiple spatial blocks + ragged tail
    # (max_thw shrunk so the small test exercises the multi-block path).
    x3 = jax.random.normal(ks[4], (2, 2, 16, 65), dtype=jnp.float32)
    t3 = jax.random.randint(ks[5], (2, 16, 65), 0, 2, dtype=jnp.int32)
    got3 = jax.block_until_ready(
        focal_loss_2d(x3, t3, gamma=2.0, alpha=0.25, size_average=True,
                      max_thw=512))
    ref3 = _reference(x3, t3, 2.0, [0.25, 0.75], True)
    assert jnp.allclose(got3, ref3, rtol=1e-5, atol=1e-5), (got3, ref3)

    # Case 4: C > 8 (VMEM alpha one-hot path), gamma=0, bf16 logits.
    C4 = 12
    alpha4 = [float(i + 1) / C4 for i in range(C4)]
    x4 = jax.random.normal(ks[6], (1, C4, 8, 20), dtype=jnp.float32).astype(jnp.bfloat16)
    t4 = jax.random.randint(ks[7], (1, 8, 20), 0, C4, dtype=jnp.int32)
    got4 = jax.block_until_ready(
        focal_loss_2d(x4, t4, gamma=0.0, alpha=alpha4, size_average=True))
    ref4 = _reference(x4.astype(jnp.float32), t4, 0.0, alpha4, True)
    assert jnp.allclose(got4, ref4, rtol=1e-4, atol=1e-4), (got4, ref4)

    print("KERNEL_OK")
</pallas_src>

<mosaic_0001>
module attributes {stable_mosaic.version = 11 : i64} {
  func.func @_focal_loss_kernel(%arg0: i32, %arg1: i32, %arg2: memref<2x4x256xf32, #tpu.memory_space<vmem>>, %arg3: memref<2x1x256xi32, #tpu.memory_space<vmem>>, %arg4: memref<4xf32, #tpu.memory_space<smem>>, %arg5: memref<1x1x1x128xf32, #tpu.memory_space<vmem>>) attributes {dimension_semantics = [#tpu.dimension_semantics<parallel>, #tpu.dimension_semantics<parallel>], iteration_bounds = array<i64: 1, 1>, scalar_prefetch = 0 : i64, scratch_operands = 0 : i64, tpu.core_type = #tpu.core_type<tc>, window_params = [{transform_indices = @transform_0, window_bounds = array<i64: 2, 4, 256>}, {transform_indices = @transform_1, window_bounds = array<i64: 2, 1, 256>}, {transform_indices = @transform_2, window_bounds = array<i64: 4>}, {transform_indices = @transform_3, window_bounds = array<i64: 1, 1, 1, 128>}]} {
    %c0 = arith.constant 0 : index
    %c0_0 = arith.constant 0 : index
    %c0_1 = arith.constant 0 : index
    %0 = vector.load %arg2[%c0, %c0_0, %c0_1] : memref<2x4x256xf32, #tpu.memory_space<vmem>>, vector<2x4x256xf32>
    %c0_2 = arith.constant 0 : index
    %c0_3 = arith.constant 0 : index
    %c0_4 = arith.constant 0 : index
    %1 = vector.load %arg3[%c0_2, %c0_3, %c0_4] : memref<2x1x256xi32, #tpu.memory_space<vmem>>, vector<2x1x256xi32>
    %cst = arith.constant dense<0xFF800000> : vector<2x256xf32>
    %2 = vector.multi_reduction <maximumf>, %0, %cst [1] : vector<2x4x256xf32> to vector<2x256xf32>
    %3 = vector.shape_cast %2 : vector<2x256xf32> to vector<2x1x256xf32>
    %4 = vector.broadcast %3 : vector<2x1x256xf32> to vector<2x4x256xf32>
    %5 = arith.subf %0, %4 : vector<2x4x256xf32>
    %6 = math.exp %5 : vector<2x4x256xf32>
    %cst_5 = arith.constant dense<0.000000e+00> : vector<2x256xf32>
    %7 = vector.multi_reduction <add>, %6, %cst_5 [1] : vector<2x4x256xf32> to vector<2x256xf32>
    %8 = vector.shape_cast %7 : vector<2x256xf32> to vector<2x1x256xf32>
    %9 = math.log %8 : vector<2x1x256xf32>
    %10 = tpu.iota {dimensions = array<i32: 1>} : vector<1x4x1xi32>
    %11 = vector.broadcast %10 : vector<1x4x1xi32> to vector<2x4x256xi32>
    %12 = vector.broadcast %1 : vector<2x1x256xi32> to vector<2x4x256xi32>
    %13 = arith.cmpi eq, %11, %12 : vector<2x4x256xi32>
    %cst_6 = arith.constant 0.000000e+00 : f32
    %14 = vector.broadcast %cst_6 : f32 to vector<2x4x256xf32>
    %15 = arith.select %13, %5, %14 : vector<2x4x256xi1>, vector<2x4x256xf32>
    %cst_7 = arith.constant dense<0.000000e+00> : vector<2x256xf32>
    %16 = vector.multi_reduction <add>, %15, %cst_7 [1] : vector<2x4x256xf32> to vector<2x256xf32>
    %17 = vector.shape_cast %16 : vector<2x256xf32> to vector<2x1x256xf32>
    %18 = arith.subf %17, %9 : vector<2x1x256xf32>
    %19 = math.exp %18 : vector<2x1x256xf32>
    %cst_8 = arith.constant 0.000000e+00 : f32
    %20 = vector.broadcast %cst_8 : f32 to vector<2x1x256xf32>
    %c0_i32 = arith.constant 0 : i32
    %21 = vector.broadcast %c0_i32 : i32 to vector<2x1x256xi32>
    %22 = arith.cmpi eq, %1, %21 : vector<2x1x256xi32>
    %c0_9 = arith.constant 0 : index
    %23 = memref.load %arg4[%c0_9] : memref<4xf32, #tpu.memory_space<smem>>
    %24 = vector.broadcast %23 : f32 to vector<2x1x256xf32>
    %25 = arith.select %22, %24, %20 : vector<2x1x256xi1>, vector<2x1x256xf32>
    %c1_i32 = arith.constant 1 : i32
    %26 = vector.broadcast %c1_i32 : i32 to vector<2x1x256xi32>
    %27 = arith.cmpi eq, %1, %26 : vector<2x1x256xi32>
    %c1 = arith.constant 1 : index
    %28 = memref.load %arg4[%c1] : memref<4xf32, #tpu.memory_space<smem>>
    %29 = vector.broadcast %28 : f32 to vector<2x1x256xf32>
    %30 = arith.select %27, %29, %25 : vector<2x1x256xi1>, vector<2x1x256xf32>
    %c2_i32 = arith.constant 2 : i32
    %31 = vector.broadcast %c2_i32 : i32 to vector<2x1x256xi32>
    %32 = arith.cmpi eq, %1, %31 : vector<2x1x256xi32>
    %c2 = arith.constant 2 : index
    %33 = memref.load %arg4[%c2] : memref<4xf32, #tpu.memory_space<smem>>
    %34 = vector.broadcast %33 : f32 to vector<2x1x256xf32>
    %35 = arith.select %32, %34, %30 : vector<2x1x256xi1>, vector<2x1x256xf32>
    %c3_i32 = arith.constant 3 : i32
    %36 = vector.broadcast %c3_i32 : i32 to vector<2x1x256xi32>
    %37 = arith.cmpi eq, %1, %36 : vector<2x1x256xi32>
    %c3 = arith.constant 3 : index
    %38 = memref.load %arg4[%c3] : memref<4xf32, #tpu.memory_space<smem>>
    %39 = vector.broadcast %38 : f32 to vector<2x1x256xf32>
    %40 = arith.select %37, %39, %35 : vector<2x1x256xi1>, vector<2x1x256xf32>
    %41 = arith.mulf %18, %40 : vector<2x1x256xf32>
    %cst_10 = arith.constant 1.000000e+00 : f32
    %42 = vector.broadcast %cst_10 : f32 to vector<2x1x256xf32>
    %43 = arith.subf %42, %19 : vector<2x1x256xf32>
    %44 = arith.mulf %43, %43 : vector<2x1x256xf32>
    %cst_11 = arith.constant 0.000000e+00 : f32
    %45 = vector.broadcast %cst_11 : f32 to vector<2x1x256xf32>
    %46 = arith.subf %45, %44 : vector<2x1x256xf32>
    %47 = arith.mulf %46, %41 : vector<2x1x256xf32>
    %cst_12 = arith.constant dense<0.000000e+00> : vector<1x256xf32>
    %48 = vector.multi_reduction <add>, %47, %cst_12 [0] : vector<2x1x256xf32> to vector<1x256xf32>
    %49 = vector.extract_strided_slice %48 {offsets = [0, 0], sizes = [1, 128], strides = [1, 1]} : vector<1x256xf32> to vector<1x128xf32>
    %50 = vector.extract_strided_slice %48 {offsets = [0, 128], sizes = [1, 128], strides = [1, 1]} : vector<1x256xf32> to vector<1x128xf32>
    %51 = arith.addf %49, %50 : vector<1x128xf32>
    %c0_13 = arith.constant 0 : index
    %c0_14 = arith.constant 0 : index
    %c0_15 = arith.constant 0 : index
    %c0_16 = arith.constant 0 : index
    %52 = vector.load %arg5[%c0_13, %c0_14, %c0_15, %c0_16] : memref<1x1x1x128xf32, #tpu.memory_space<vmem>>, vector<1x1x1x128xf32>
    %53 = vector.shape_cast %52 : vector<1x1x1x128xf32> to vector<1x128xf32>
    %54 = vector.shape_cast %51 : vector<1x128xf32> to vector<1x1x1x128xf32>
    tpu.vector_store %arg5[%c0_13, %c0_14, %c0_15, %c0_16], %54 {strides = array<i32>} : memref<1x1x1x128xf32, #tpu.memory_space<vmem>>, vector<1x1x1x128xf32>,
    return
  }
  func.func @transform_0(%arg0: i32, %arg1: i32) -> (i32, i32, i32) {
    %c0_i32 = arith.constant 0 : i32
    %c0_i32_0 = arith.constant 0 : i32
    return %arg0, %c0_i32, %arg1 : i32, i32, i32
  }
  func.func @transform_1(%arg0: i32, %arg1: i32) -> (i32, i32, i32) {
    %c0_i32 = arith.constant 0 : i32
    %c0_i32_0 = arith.constant 0 : i32
    return %arg0, %c0_i32, %arg1 : i32, i32, i32
  }
  func.func @transform_2(%arg0: i32, %arg1: i32) -> i32 {
    %c0_i32 = arith.constant 0 : i32
    %c0_i32_0 = arith.constant 0 : i32
    return %c0_i32 : i32
  }
  func.func @transform_3(%arg0: i32, %arg1: i32) -> (i32, i32, i32, i32) {
    %c0_i32 = arith.constant 0 : i32
    %c0_i32_0 = arith.constant 0 : i32
    %c0_i32_1 = arith.constant 0 : i32
    return %arg0, %arg1, %c0_i32, %c0_i32_0 : i32, i32, i32, i32
  }
}

</mosaic_0001>

<bundles_post_ra>
// kernel: tpu_custom_call.1
= control target key start
LH: loop header
LB: loop body
LE: loop exit
PB: predicated region body
PF: predicated region fallthrough
CT: control target
= control target key end

     0   :  { %8 = vsyncpa [#allocation3], 0  ;;  %s529_s0 = inlined_call_operand.hbm [shape: f32[2,4,256], index: 0, kind: input, shape index: {}]   ;;  %s530_s1 = inlined_call_operand.hbm [shape: s32[2,1,256], index: 1, kind: input, shape index: {}]   ;;  %s531_s2 = inlined_call_operand.vmem [shape: f32[4], index: 2, kind: input, shape index: {}]   ;;  %s532_s3 = inlined_call_operand.hbm [shape: f32[1,1,1,128], index: 3, kind: output, shape index: {}]  }
   0x1   :  { %9 = vsyncpa [#allocation7], 0 }
   0x2   :  { %10 = vsyncpa [#allocation5], 0 }
   0x3   :  { %11 = vsyncpa [#allocation4], 0  ;;  %s428_s12 = smov [#allocation2]  }
   0x4   :  { %s17_s13 = sshll.u32 %s428_s12, 4  ;;  %s18_s13 = int_to_ptr.vmem [resolvable:$true] %s17_s13 }
   0x5   :  { %s356_s14 = scalar_lea.vmem %s18_s13, 256  ;;  %p361_p1 = scmp.lt.s32.totalorder %s18_s13, %s18_s13 }
   0x6   :  { %p357_p0 = scmp.ne.s32.totalorder %s18_s13, %s356_s14  ;;  %p362_p2 = scmp.lt.s32.totalorder %s356_s14, %s356_s14 }
   0x8   :  { %p363_p3 = por %p362_p2, %p361_p1 }
   0xa   :  { %p364_p4 = pnand %p363_p3, %p357_p0 }
   0xc   :  { %367 = shalt.err (!%p364_p4)
}
   0xd   :  { %s429_s15 = smov 128   ;;  %s430_s16 = smov 8  }
   0xe   :  { %23 = dma.hbm_to_vmem [thread:$0]  %s529_s0, 256, %s18_s13, [#allocation3], %s429_s15, %s429_s15, %s430_s16  }
   0xf   :  { %s431_s19 = smov [#allocation6]  }
  0x10   :  { %s29_s20 = sshll.u32 %s431_s19, 4  ;;  %s30_s20 = int_to_ptr.vmem [resolvable:$true] %s29_s20 }
  0x11   :  { %s376_s21 = scalar_lea.vmem %s30_s20, 64  ;;  %p381_p6 = scmp.lt.s32.totalorder %s30_s20, %s30_s20 }
  0x12   :  { %p377_p5 = scmp.ne.s32.totalorder %s30_s20, %s376_s21  ;;  %p382_p7 = scmp.lt.s32.totalorder %s376_s21, %s376_s21 }
  0x14   :  { %p383_p8 = por %p382_p7, %p381_p6 }
  0x16   :  { %p384_p9 = pnand %p383_p8, %p377_p5 }
  0x18   :  { %387 = shalt.err (!%p384_p9)
}
  0x19   :  { %s432_s22 = smov 32   ;;  %s433_s23 = smov 2  }
  0x1a   :  { %35 = dma.hbm_to_vmem [thread:$0]  %s530_s1, 64, %s30_s20, [#allocation7], %s432_s22, %s432_s22, %s433_s23  }
  0x1b   :  { %s42_s0 = sshll.u32 %s531_s2, 4  ;;  %s43_s0 = int_to_ptr.vmem [resolvable:$true] %s42_s0 }
  0x1c   :  { %s388_s28 = scalar_lea.vmem %s43_s0, 16  ;;  %p393_p11 = scmp.lt.s32.totalorder %s43_s0, %s43_s0 }
  0x1d   :  { %p389_p10 = scmp.ne.s32.totalorder %s43_s0, %s388_s28  ;;  %p394_p12 = scmp.lt.s32.totalorder %s388_s28, %s388_s28 }
  0x1f   :  { %p395_p13 = por %p394_p12, %p393_p11 }
  0x21   :  { %p396_p0 = pnand %p395_p13, %p389_p10 }
  0x23   :  { %399 = shalt.err (!%p396_p0)
}
  0x24   :  { %s434_s29 = smov [#allocation8]  }
  0x25   :  { %45 = dma.vmem_to_smem %s43_s0, 16, %s434_s29, [#allocation5]  }
  0x26   :  { %420 = dma.done.wait [#allocation3], 256  }
  0x27   :  { %421 = vsyncadd [#allocation3], 4294967040 }
  0x28   :  { %422 = dma.done.wait [#allocation7], 64  }
  0x29   :  { %423 = vsyncadd [#allocation7], 4294967232 }
  0x2a   :  { %424 = dma.done.wait [#allocation5], 16  }
  0x2b   :  { %425 = vsyncadd [#allocation5], 4294967280 }
  0x2c   :  { %55 = sfence }
  0x2d   :  { %v56_v0 = vld [vmem:[#allocation2] sm:$0xff]  ;;  %v57_v1 = vld [vmem:[#allocation2 + $0x8] sm:$0xff]  ;;  %vm66_vm0 = vcmask 1043456   ;;  %v151_v34 = vlaneseq  ;;  %v471_v41 = vld [vmem:[#allocation6] sm:$0x3]  ;;  %s505_s1 = sld [smem:[#allocation8]] }
  0x2e   :  { %v62_v2 = vcombine.high %v56_v0, %v56_v0  ;;  %v63_v3 = vcombine.high %v57_v1, %v57_v1  ;;  %v67_v4 = vsel %vm66_vm0, %v56_v0, -inf  ;;  %v81_v5 = vsel %vm66_vm0, %v57_v1, -inf  ;;  %v473_v42 = vld [vmem:[#allocation6 + $0x2] sm:$0x3]  ;;  %s507_s2 = sld [smem:[#allocation8 + $0x1]]  ;;  %s435_s5 = smov [#allocation9]  }
  0x2f   :  { %v68_v6 = vrot.slane %v67_v4, 4  ;;  %v82_v7 = vrot.slane %v81_v5, 4  ;;  %v152_v39 = vshrl.u32 %v151_v34, 7  ;;  %s509_s30 = sld [smem:[#allocation8 + $0x2]]  ;;  %vm223_vm5 = vcmp.eq.s32.totalorder %v471_v41, 0  ;;  %s304_s6 = sshll.u32 %s435_s5, 4  ;;  %s305_s6 = int_to_ptr.vmem [resolvable:$true] %s304_s6 }
  0x30   :  { %v74_v8 = vsel %vm66_vm0, %v62_v2, -inf  ;;  %v88_v9 = vsel %vm66_vm0, %v63_v3, -inf  ;;  %vm224_vm6 = vcmp.eq.s32.totalorder %v473_v42, 0  ;;  %s317_s4 = sld [smem:[#allocation8 + $0x3]]  ;;  %vm229_vm7 = vcmp.eq.s32.totalorder %v471_v41, 1  ;;  %s400_s7 = scalar_lea.vmem %s305_s6, 16 }
  0x31   :  { %v69_v10 = vmax.f32 %v67_v4, %v68_v6  ;;  %v75_v11 = vrot.slane %v74_v8, 4  ;;  %v83_v12 = vmax.f32 %v81_v5, %v82_v7  ;;  %v89_v13 = vrot.slane %v88_v9, 4  ;;  %p401_p1 = scmp.ne.s32.totalorder %s305_s6, %s400_s7  ;;  %s404_s8 = scalar_lea.vmem %s305_s6, 32 }
  0x32   :  { %v469_v40 = vsub.s32 0, %v152_v39  ;;  %v475_v43 = vsub.s32 1, %v152_v39  ;;  %vm230_vm8 = vcmp.eq.s32.totalorder %v473_v42, 1  ;;  %vm235_vm9 = vcmp.eq.s32.totalorder %v471_v41, 2  ;;  %p405_p2 = scmp.lt.s32.totalorder %s305_s6, %s305_s6  ;;  %p406_p3 = scmp.lt.s32.totalorder %s404_s8, %s400_s7 }
  0x33   :  { %v70_v14 = vrot.slane %v69_v10, 2  ;;  %v76_v15 = vmax.f32 %v74_v8, %v75_v11  ;;  %v84_v16 = vrot.slane %v83_v12, 2  ;;  %v90_v17 = vmax.f32 %v88_v9, %v89_v13 }
  0x34   :  { %v156_v44 = vrot.slane %v471_v41, %v469_v40  ;;  %v164_v45 = vrot.slane %v473_v42, %v469_v40  ;;  %v160_v46 = vrot.slane %v471_v41, %v475_v43  ;;  %v168_v47 = vrot.slane %v473_v42, %v475_v43  ;;  %p407_p4 = por %p406_p3, %p405_p2 }
  0x35   :  { %v71_v18 = vmax.f32 %v69_v10, %v70_v14  ;;  %v77_v19 = vrot.slane %v76_v15, 2  ;;  %v85_v20 = vmax.f32 %v83_v12, %v84_v16  ;;  %v91_v21 = vrot.slane %v90_v17, 2 }
  0x36   :  { %vm485_vm1 = vcmp.eq.s32.totalorder %v152_v39, %v156_v44  ;;  %vm489_vm2 = vcmp.eq.s32.totalorder %v152_v39, %v164_v45  ;;  %vm170_vm3 = vcmp.eq.s32.totalorder %v152_v39, %v160_v46  ;;  %vm172_vm4 = vcmp.eq.s32.totalorder %v152_v39, %v168_v47  ;;  %p408_p5 = pnand %p407_p4, %p401_p1 }
  0x37   :  { %v72_v22 = vrot.slane %v71_v18, 1  ;;  %v78_v23 = vmax.f32 %v76_v15, %v77_v19  ;;  %v86_v24 = vrot.slane %v85_v20, 1  ;;  %v92_v25 = vmax.f32 %v90_v17, %v91_v21 }
  0x38   :  { %vm236_vm10 = vcmp.eq.s32.totalorder %v473_v42, 2  ;;  %vm241_vm11 = vcmp.eq.s32.totalorder %v471_v41, 3  ;;  %vm242_vm12 = vcmp.eq.s32.totalorder %v473_v42, 3  ;;  %vm289_vm13 = vcmask 1040384  }
  0x39   :  { %v73_v26 = vmax.f32 %v71_v18, %v72_v22  ;;  %v79_v27 = vrot.slane %v78_v23, 1  ;;  %v87_v28 = vmax.f32 %v85_v20, %v86_v24  ;;  %v93_v29 = vrot.slane %v92_v25, 1 }
  0x3b   :  { %v80_v30 = vmax.f32 %v78_v23, %v79_v27  ;;  %v94_v31 = vmax.f32 %v92_v25, %v93_v29 }
  0x3d   :  { %v99_v32 = vcombine.low %v73_v26, %v80_v30  ;;  %v100_v33 = vcombine.low %v87_v28, %v94_v31 }
  0x3f   :  { %v103_v35 = vsub.f32 %v56_v0, %v99_v32  ;;  %v104_v36 = vsub.f32 %v57_v1, %v100_v33 }
  0x41   :  { %v105_v37 = vmul.f32 1.442695, %v103_v35  ;;  %v107_v38 = vmul.f32 1.442695, %v104_v36  ;;  %v175_v50 = vcombine.high %v103_v35, %v103_v35  ;;  %v176_v51 = vcombine.high %v104_v36, %v104_v36 }
  0x42   :  { %v179_v53 = vsel %vm485_vm1, %v103_v35, 0.0  ;;  %v181_v57 = vsel %vm489_vm2, %v104_v36, 0.0 }
  0x43   :  { %328 = vpow2.f32 %v105_v37  ;;  %v180_v61 = vsel %vm170_vm3, %v175_v50, 0.0  ;;  %v182_v0 = vsel %vm172_vm4, %v176_v51, 0.0  ;;  %v183_v1 = vsel %vm66_vm0, %v179_v53, 0.0 }
  0x44   :  { %330 = vpow2.f32 %v107_v38  ;;  %v197_v5 = vsel %vm66_vm0, %v181_v57, 0.0  ;;  %v190_v8 = vsel %vm66_vm0, %v180_v61, 0.0  ;;  %v184_v11 = vrot.slane %v183_v1, 4 }
  0x45   :  { %v204_v12 = vsel %vm66_vm0, %v182_v0, 0.0  ;;  %v198_v15 = vrot.slane %v197_v5, 4  ;;  %v191_v18 = vrot.slane %v190_v8, 4 }
  0x46   :  { %v205_v21 = vrot.slane %v204_v12, 4  ;;  %v185_v24 = vadd.f32 %v184_v11, %v183_v1 }
  0x47   :  { %v199_v27 = vadd.f32 %v198_v15, %v197_v5  ;;  %v192_v30 = vadd.f32 %v191_v18, %v190_v8 }
  0x48   :  { %v206_v33 = vadd.f32 %v205_v21, %v204_v12  ;;  %v186_v35 = vrot.slane %v185_v24, 2 }
  0x49   :  { %v200_v37 = vrot.slane %v199_v27, 2  ;;  %v193_v38 = vrot.slane %v192_v30, 2 }
  0x4a   :  { %v207_v39 = vrot.slane %v206_v33, 2  ;;  %v187_v44 = vadd.f32 %v186_v35, %v185_v24 }
  0x4b   :  { %v201_v45 = vadd.f32 %v200_v37, %v199_v27  ;;  %v194_v46 = vadd.f32 %v193_v38, %v192_v30 }
  0x4c   :  { %v208_v47 = vadd.f32 %v207_v39, %v206_v33  ;;  %v188_v48 = vrot.slane %v187_v44, 1 }
  0x4d   :  { %v202_v49 = vrot.slane %v201_v45, 1  ;;  %v195_v50 = vrot.slane %v194_v46, 1 }
  0x4e   :  { %v209_v51 = vrot.slane %v208_v47, 1 }
  0x4f   :  { %v196_v57 = vadd.f32 %v195_v50, %v194_v46 }
  0x50   :  { %v329_v52 = vpop.eup %328 }
  0x51   :  { %v331_v54 = vpop.eup %330  ;;  %v111_v55 = vcombine.high %v329_v52, %v329_v52  ;;  %v115_v56 = vsel %vm66_vm0, %v329_v52, 0.0  ;;  %v189_v52 = vadd.f32 %v188_v48, %v187_v44 }
  0x52   :  { %v112_v58 = vcombine.high %v331_v54, %v331_v54  ;;  %v116_v59 = vrot.slane %v115_v56, 4  ;;  %v129_v60 = vsel %vm66_vm0, %v331_v54, 0.0  ;;  %v203_v54 = vadd.f32 %v202_v49, %v201_v45 }
  0x53   :  { %v122_v62 = vsel %vm66_vm0, %v111_v55, 0.0  ;;  %v130_v63 = vrot.slane %v129_v60, 4 }
  0x54   :  { %v117_v2 = vadd.f32 %v116_v59, %v115_v56  ;;  %v123_v3 = vrot.slane %v122_v62, 4  ;;  %v136_v4 = vsel %vm66_vm0, %v112_v58, 0.0 }
  0x55   :  { %v131_v6 = vadd.f32 %v130_v63, %v129_v60  ;;  %v137_v7 = vrot.slane %v136_v4, 4  ;;  %v210_v60 = vadd.f32 %v209_v51, %v208_v47 }
  0x56   :  { %v118_v9 = vrot.slane %v117_v2, 2  ;;  %v124_v10 = vadd.f32 %v123_v3, %v122_v62 }
  0x57   :  { %v132_v13 = vrot.slane %v131_v6, 2  ;;  %v138_v14 = vadd.f32 %v137_v7, %v136_v4 }
  0x58   :  { %v119_v16 = vadd.f32 %v118_v9, %v117_v2  ;;  %v125_v17 = vrot.slane %v124_v10, 2  ;;  %v226_v2 = vstv %s505_s1  ;;  %v232_v9 = vstv %s507_s2 }
  0x59   :  { %v133_v19 = vadd.f32 %v132_v13, %v131_v6  ;;  %v139_v20 = vrot.slane %v138_v14, 2  ;;  %v227_v8 = vsel %vm223_vm5, %v226_v2, 0.0  ;;  %v228_v11 = vsel %vm224_vm6, %v226_v2, 0.0 }
  0x5a   :  { %v120_v22 = vrot.slane %v119_v16, 1  ;;  %v126_v23 = vadd.f32 %v125_v17, %v124_v10  ;;  %v233_v12 = vsel %vm229_vm7, %v232_v9, %v227_v8  ;;  %v238_v13 = vstv %s509_s30 }
  0x5b   :  { %v134_v25 = vrot.slane %v133_v19, 1  ;;  %v140_v26 = vadd.f32 %v139_v20, %v138_v14  ;;  %v234_v14 = vsel %vm230_vm8, %v232_v9, %v228_v11  ;;  %v239_v15 = vsel %vm235_vm9, %v238_v13, %v233_v12 }
  0x5c   :  { %v121_v28 = vadd.f32 %v120_v22, %v119_v16  ;;  %v127_v29 = vrot.slane %v126_v23, 1  ;;  %v244_v16 = vstv %s317_s4  ;;  %v240_v17 = vsel %vm236_vm10, %v238_v13, %v234_v14 }
  0x5d   :  { %v135_v31 = vadd.f32 %v134_v25, %v133_v19  ;;  %v141_v32 = vrot.slane %v140_v26, 1  ;;  %v245_v18 = vsel %vm241_vm11, %v244_v16, %v239_v15  ;;  %v246_v19 = vsel %vm242_vm12, %v244_v16, %v240_v17 }
  0x5e   :  { %v128_v34 = vadd.f32 %v127_v29, %v126_v23  ;;  %332 = vlog2.f32 %v121_v28  ;;  %v252_v20 = vrot.slane %v245_v18, %v469_v40  ;;  %v260_v22 = vrot.slane %v246_v19, %v469_v40 }
  0x5f   :  { %v142_v36 = vadd.f32 %v141_v32, %v140_v26  ;;  %334 = vlog2.f32 %v135_v31  ;;  %v256_v24 = vrot.slane %v245_v18, %v475_v43  ;;  %v264_v27 = vrot.slane %v246_v19, %v475_v43 }
  0x60   :  { %336 = vlog2.f32 %v128_v34 }
  0x61   :  { %338 = vlog2.f32 %v142_v36 }
  0x6b   :  { %v333_v53 = vpop.eup %332 }
  0x6c   :  { %v335_v55 = vpop.eup %334  ;;  %v144_v56 = vmul.f32 0.6931472, %v333_v53 }
  0x6d   :  { %v337_v58 = vpop.eup %336  ;;  %v148_v59 = vmul.f32 0.6931472, %v335_v55 }
  0x6e   :  { %v339_v61 = vpop.eup %338  ;;  %v146_v62 = vmul.f32 0.6931472, %v337_v58  ;;  %v211_v63 = vsub.f32 %v189_v52, %v144_v56 }
  0x6f   :  { %v150_v0 = vmul.f32 0.6931472, %v339_v61  ;;  %v213_v1 = vsub.f32 %v203_v54, %v148_v59 }
  0x70   :  { %v212_v3 = vsub.f32 %v196_v57, %v146_v62  ;;  %v215_v4 = vmul.f32 1.442695, %v211_v63  ;;  %v269_v29 = vmul.f32 %v252_v20, %v211_v63 }
  0x71   :  { %v214_v5 = vsub.f32 %v210_v60, %v150_v0  ;;  %v219_v6 = vmul.f32 1.442695, %v213_v1  ;;  %v271_v42 = vmul.f32 %v260_v22, %v213_v1 }
  0x72   :  { %340 = vpow2.f32 %v215_v4  ;;  %v217_v7 = vmul.f32 1.442695, %v212_v3  ;;  %v270_v34 = vmul.f32 %v256_v24, %v212_v3 }
  0x73   :  { %342 = vpow2.f32 %v219_v6  ;;  %v221_v10 = vmul.f32 1.442695, %v214_v5  ;;  %v272_v37 = vmul.f32 %v264_v27, %v214_v5 }
  0x74   :  { %344 = vpow2.f32 %v217_v7 }
  0x75   :  { %346 = vpow2.f32 %v221_v10 }
  0x7f   :  { %v341_v21 = vpop.eup %340 }
  0x80   :  { %v343_v23 = vpop.eup %342  ;;  %v273_v25 = vsub.f32 1.0, %v341_v21 }
  0x81   :  { %v345_v26 = vpop.eup %344  ;;  %v275_v28 = vsub.f32 1.0, %v343_v23 }
  0x82   :  { %v347_v41 = vpop.eup %346  ;;  %v274_v30 = vsub.f32 1.0, %v345_v26  ;;  %v277_v31 = vmul.f32 %v273_v25, %v273_v25 }
  0x83   :  { %v276_v32 = vsub.f32 1.0, %v347_v41  ;;  %v279_v33 = vmul.f32 %v275_v28, %v275_v28 }
  0x84   :  { %v278_v35 = vmul.f32 %v274_v30, %v274_v30  ;;  %v281_v36 = vsub.f32 0.0, %v277_v31 }
  0x85   :  { %v280_v40 = vmul.f32 %v276_v32, %v276_v32  ;;  %v283_v38 = vsub.f32 0.0, %v279_v33 }
  0x86   :  { %v282_v39 = vsub.f32 0.0, %v278_v35  ;;  %v285_v44 = vmul.f32 %v281_v36, %v269_v29 }
  0x87   :  { %v284_v45 = vsub.f32 0.0, %v280_v40  ;;  %v287_v46 = vmul.f32 %v283_v38, %v271_v42 }
  0x88   :  { %v286_v43 = vmul.f32 %v282_v39, %v270_v34  ;;  %v290_v47 = vsel %vm289_vm13, %v285_v44, 0.0 }
  0x89   :  { %v288_v48 = vmul.f32 %v284_v45, %v272_v37  ;;  %v291_v49 = vsel %vm289_vm13, %v287_v46, 0.0 }
  0x8a   :  { %v292_v50 = vadd.f32 %v291_v49, %v290_v47  ;;  %v293_v51 = vsel %vm289_vm13, %v286_v43, 0.0 }
  0x8b   :  { %v294_v52 = vsel %vm289_vm13, %v288_v48, 0.0 }
  0x8c   :  { %v295_v53 = vadd.f32 %v294_v52, %v293_v51 }
  0x8e   :  { %v296_v54 = vadd.f32 %v295_v53, %v292_v50 }
  0x90   :  { %297 = vst [vmem:[#allocation9] sm:$0x1] %v296_v54 }
  0x91   :  { %411 = shalt.err (!%p408_p5)
}
  0x92   :  { %307 = dma.vmem_to_hbm [thread:$0]  %s305_s6, 16, %s532_s3, [#allocation4]  }
  0x93   :  { %426 = dma.done.wait [#allocation4], 16  }
  0x94   :  { %427 = vsyncadd [#allocation4], 4294967280 }
  0x95   :  { %311 = vsyncpa [#allocation3], 1 }
  0x96   :  { %312 = vsyncpa [#allocation7], 1 }
  0x97   :  { %313 = vsyncpa [#allocation4], 1 }
  0x98   :  { %314 = vsyncpa [#allocation5], 1 }

</bundles_post_ra>
